<compile_context>
chip_gen: v7x
topology: tpu7x:2x2x1
jax: 0.10.0
libtpu: 0.0.40
codegen_flags: <defaults>
</compile_context>

<pallas_src>
import functools

import jax
import jax.numpy as jnp
from jax.experimental import pallas as pl
from jax.experimental.pallas import tpu as pltpu


def _bn1d_kernel(x_ref, gamma_ref, beta_ref, o_ref, *, eps):
    """Training-mode BatchNorm1d on a (B, TF) tile; reduction over batch axis."""
    j = pl.program_id(0)
    x = x_ref[...].astype(jnp.float32)                           # (B, TF)
    mean = jnp.mean(x, axis=0, keepdims=True)                    # (1, TF)
    centered = x - mean
    var = jnp.mean(centered * centered, axis=0, keepdims=True)   # biased var, (1, TF)
    # gamma/beta live in one resident (n_tiles, TF) block; pick this tile's row
    # with a dynamic sublane index (first-axis dynamic indexing is cheap).
    gamma = gamma_ref[pl.ds(j, 1), :].astype(jnp.float32)        # (1, TF)
    beta = beta_ref[pl.ds(j, 1), :].astype(jnp.float32)          # (1, TF)
    scale = jax.lax.rsqrt(var + eps) * gamma                     # fold gamma on the row
    o_ref[...] = (centered * scale + beta).astype(o_ref.dtype)


def _pick_feat_tile(batch, f_pad, itemsize, vmem_budget_bytes=12 << 20):
    """Largest feature tile (multiple of 128, dividing f_pad) fitting the VMEM budget.

    Working set per grid step ~ (2 in bufs + 2 out bufs) * B * tile * itemsize
    plus f32 compute temporaries (~2 * B * tile * 4).  Budget is kept well under
    the smallest default scoped-VMEM limit (v7x) so no vmem_limit bump is needed.
    """
    bytes_per_lane = batch * (4 * itemsize + 8)
    max_tile = max(128, vmem_budget_bytes // bytes_per_lane)
    candidates = [t for t in range(128, f_pad + 1, 128)
                  if f_pad % t == 0 and t <= max_tile]
    tile = max(candidates) if candidates else 128
    # v7x megacore: when there is enough data to matter, keep >=2 parallel grid
    # steps so both TensorCores get a feature half.
    if tile == f_pad and f_pad % 256 == 0 and batch * f_pad * itemsize > (2 << 20):
        tile = f_pad // 2
    return tile


def batchnorm1d_pallas(x, gamma, beta, *, eps=1e-5, feat_tile=None):
    """BatchNorm1d with training-mode batch statistics over a (B, F) input."""
    B, F = x.shape
    if B < 2:
        # PyTorch BatchNorm1d in train mode rejects batch size 1 (var undefined).
        raise ValueError("batchnorm1d_pallas requires batch size >= 2 in training mode")

    itemsize = jnp.dtype(x.dtype).itemsize
    f_pad = ((F + 127) // 128) * 128
    if f_pad != F:
        pad = f_pad - F
        x_p = jnp.pad(x, ((0, 0), (0, pad)))
        gamma_p = jnp.pad(gamma, (0, pad), constant_values=1.0)
        beta_p = jnp.pad(beta, (0, pad))
    else:
        x_p, gamma_p, beta_p = x, gamma, beta

    if feat_tile is None:
        feat_tile = _pick_feat_tile(B, f_pad, itemsize)
    assert f_pad % feat_tile == 0 and feat_tile % 128 == 0
    n_tiles = f_pad // feat_tile

    gamma2d = gamma_p.reshape(n_tiles, feat_tile)
    beta2d = beta_p.reshape(n_tiles, feat_tile)

    kernel = functools.partial(_bn1d_kernel, eps=eps)
    out = pl.pallas_call(
        kernel,
        out_shape=jax.ShapeDtypeStruct((B, f_pad), x.dtype),
        grid_spec=pl.GridSpec(
            grid=(n_tiles,),
            in_specs=[
                # x: full batch, one big lane-dense feature tile per step.
                pl.BlockSpec((B, feat_tile), lambda j: (0, j)),
                # gamma/beta: whole array as one resident block (constant index
                # map -> fetched once, not re-DMA'd per grid step).
                pl.BlockSpec((n_tiles, feat_tile), lambda j: (0, 0)),
                pl.BlockSpec((n_tiles, feat_tile), lambda j: (0, 0)),
            ],
            out_specs=pl.BlockSpec((B, feat_tile), lambda j: (0, j)),
        ),
        compiler_params=pltpu.CompilerParams(
            dimension_semantics=("parallel",),
        ),
    )(x_p, gamma2d, beta2d)

    return out[:, :F] if f_pad != F else out


class ReidClsVitB:
    """JAX/Pallas port of reid_cls_vit_B (feature_bn path, feature_only=True)."""

    def __init__(self, out_feature, feature_bn=True, bn_eps=1e-5, dtype=jnp.float32):
        self.feature_bn = feature_bn
        self.bn_eps = bn_eps
        if feature_bn:
            # weights_init_kaiming on BatchNorm: weight <- 1.0, bias <- 0.0
            # (bias additionally has requires_grad=False in the PyTorch module).
            self.bn_weight = jnp.ones((out_feature,), dtype=dtype)
            self.bn_bias = jnp.zeros((out_feature,), dtype=dtype)
        # TODO(synk): loss_entry(loss_cfg) classifier/loss head is an external,
        # config-driven module with unspecified structure; only the feature path
        # (feature_only behaviour) is implemented here.
        # TODO(synk): eval-mode running_mean/running_var tracking (bn_momentum) is
        # not implemented; only training-mode batch statistics are computed.

    def __call__(self, input_var):
        output = {}
        features_nobn = input_var['neck_output']['cls_feats']  # (B, out_feature)
        if self.feature_bn:
            features = batchnorm1d_pallas(
                features_nobn, self.bn_weight, self.bn_bias, eps=self.bn_eps)
        else:
            features = features_nobn
        labels = input_var['label']
        output['feature'] = features
        output['feature_nobn'] = features_nobn
        output['label'] = labels
        return output


def _reference_bn(x, gamma, beta, eps):
    x32 = x.astype(jnp.float32)
    mean = jnp.mean(x32, axis=0, keepdims=True)
    var = jnp.mean((x32 - mean) ** 2, axis=0, keepdims=True)
    return ((x32 - mean) / jnp.sqrt(var + eps) * gamma + beta).astype(x.dtype)


if __name__ == "__main__":
    key = jax.random.PRNGKey(0)
    B, OUT_FEATURE = 8, 768   # ViT-B cls feature dim

    k_feat, k_lbl, k_pad = jax.random.split(key, 3)
    cls_feats = jax.random.normal(k_feat, (B, OUT_FEATURE), dtype=jnp.float32)
    labels = jax.random.randint(k_lbl, (B,), 0, 10, dtype=jnp.int32)

    input_var = {
        'neck_output': {'cls_feats': cls_feats},
        'label': labels,
    }

    model = ReidClsVitB(out_feature=OUT_FEATURE, feature_bn=True, bn_eps=1e-5)
    out = model(input_var)
    jax.block_until_ready(out['feature'])

    ref = _reference_bn(cls_feats, model.bn_weight, model.bn_bias, 1e-5)
    assert jnp.allclose(out['feature'], ref, atol=1e-5, rtol=1e-5), "mismatch vs reference"
    assert out['feature_nobn'] is cls_feats
    assert out['label'] is labels

    # Non-multiple-of-128 feature dim exercises the padding path.
    F_ODD = 200
    x_odd = jax.random.normal(k_pad, (B, F_ODD), dtype=jnp.float32)
    g_odd = jnp.ones((F_ODD,), jnp.float32)
    b_odd = jnp.zeros((F_ODD,), jnp.float32)
    y_odd = batchnorm1d_pallas(x_odd, g_odd, b_odd, eps=1e-5)
    jax.block_until_ready(y_odd)
    ref_odd = _reference_bn(x_odd, g_odd, b_odd, 1e-5)
    assert jnp.allclose(y_odd, ref_odd, atol=1e-5, rtol=1e-5), "padded-F mismatch"

    print("KERNEL_OK")
</pallas_src>

<mosaic_0001>
module attributes {stable_mosaic.version = 11 : i64} {
  func.func @_bn1d_kernel(%arg0: i32, %arg1: memref<8x768xf32, #tpu.memory_space<vmem>>, %arg2: memref<1x768xf32, #tpu.memory_space<vmem>>, %arg3: memref<1x768xf32, #tpu.memory_space<vmem>>, %arg4: memref<8x768xf32, #tpu.memory_space<vmem>>) attributes {dimension_semantics = [#tpu.dimension_semantics<parallel>], iteration_bounds = array<i64: 1>, scalar_prefetch = 0 : i64, scratch_operands = 0 : i64, tpu.core_type = #tpu.core_type<tc>, window_params = [{transform_indices = @transform_0, window_bounds = array<i64: 8, 768>}, {pipeline_mode = #tpu.pipeline_mode<synchronous>, transform_indices = @transform_1, window_bounds = array<i64: 1, 768>}, {pipeline_mode = #tpu.pipeline_mode<synchronous>, transform_indices = @transform_2, window_bounds = array<i64: 1, 768>}, {transform_indices = @transform_3, window_bounds = array<i64: 8, 768>}]} {
    %c0 = arith.constant 0 : index
    %c0_0 = arith.constant 0 : index
    %0 = vector.load %arg1[%c0, %c0_0] : memref<8x768xf32, #tpu.memory_space<vmem>>, vector<8x768xf32>
    %cst = arith.constant dense<0.000000e+00> : vector<768xf32>
    %1 = vector.multi_reduction <add>, %0, %cst [0] : vector<8x768xf32> to vector<768xf32>
    %2 = vector.shape_cast %1 : vector<768xf32> to vector<1x768xf32>
    %cst_1 = arith.constant 8.000000e+00 : f32
    %3 = vector.broadcast %cst_1 : f32 to vector<1x768xf32>
    %4 = arith.divf %2, %3 : vector<1x768xf32>
    %5 = vector.broadcast %4 : vector<1x768xf32> to vector<8x768xf32>
    %6 = arith.subf %0, %5 : vector<8x768xf32>
    %7 = arith.mulf %6, %6 : vector<8x768xf32>
    %cst_2 = arith.constant dense<0.000000e+00> : vector<768xf32>
    %8 = vector.multi_reduction <add>, %7, %cst_2 [0] : vector<8x768xf32> to vector<768xf32>
    %9 = vector.shape_cast %8 : vector<768xf32> to vector<1x768xf32>
    %cst_3 = arith.constant 8.000000e+00 : f32
    %10 = vector.broadcast %cst_3 : f32 to vector<1x768xf32>
    %11 = arith.divf %9, %10 : vector<1x768xf32>
    %12 = arith.index_cast %arg0 : i32 to index
    %c0_4 = arith.constant 0 : index
    %13 = vector.load %arg2[%12, %c0_4] : memref<1x768xf32, #tpu.memory_space<vmem>>, vector<1x768xf32>
    %14 = arith.index_cast %arg0 : i32 to index
    %c0_5 = arith.constant 0 : index
    %15 = vector.load %arg3[%14, %c0_5] : memref<1x768xf32, #tpu.memory_space<vmem>>, vector<1x768xf32>
    %cst_6 = arith.constant 9.99999974E-6 : f32
    %16 = vector.broadcast %cst_6 : f32 to vector<1x768xf32>
    %17 = arith.addf %11, %16 : vector<1x768xf32>
    %18 = math.rsqrt %17 : vector<1x768xf32>
    %19 = arith.mulf %18, %13 : vector<1x768xf32>
    %20 = vector.broadcast %19 : vector<1x768xf32> to vector<8x768xf32>
    %21 = arith.mulf %6, %20 : vector<8x768xf32>
    %22 = vector.broadcast %15 : vector<1x768xf32> to vector<8x768xf32>
    %23 = arith.addf %21, %22 : vector<8x768xf32>
    %c0_7 = arith.constant 0 : index
    %c0_8 = arith.constant 0 : index
    %24 = vector.load %arg4[%c0_7, %c0_8] : memref<8x768xf32, #tpu.memory_space<vmem>>, vector<8x768xf32>
    tpu.vector_store %arg4[%c0_7, %c0_8], %23 {strides = array<i32>} : memref<8x768xf32, #tpu.memory_space<vmem>>, vector<8x768xf32>,
    return
  }
  func.func @transform_0(%arg0: i32) -> (i32, i32) {
    %c0_i32 = arith.constant 0 : i32
    %c0_i32_0 = arith.constant 0 : i32
    return %c0_i32, %arg0 : i32, i32
  }
  func.func @transform_1(%arg0: i32) -> (i32, i32) {
    %c0_i32 = arith.constant 0 : i32
    %c0_i32_0 = arith.constant 0 : i32
    %c0_i32_1 = arith.constant 0 : i32
    return %c0_i32, %c0_i32_0 : i32, i32
  }
  func.func @transform_2(%arg0: i32) -> (i32, i32) {
    %c0_i32 = arith.constant 0 : i32
    %c0_i32_0 = arith.constant 0 : i32
    %c0_i32_1 = arith.constant 0 : i32
    return %c0_i32, %c0_i32_0 : i32, i32
  }
  func.func @transform_3(%arg0: i32) -> (i32, i32) {
    %c0_i32 = arith.constant 0 : i32
    %c0_i32_0 = arith.constant 0 : i32
    return %c0_i32, %arg0 : i32, i32
  }
}

</mosaic_0001>

<bundles_post_ra>
// kernel: tpu_custom_call.1
= control target key start
LH: loop header
LB: loop body
LE: loop exit
PB: predicated region body
PF: predicated region fallthrough
CT: control target
= control target key end

     0   :  { %8 = vsyncpa [#allocation3], 0  ;;  %s464_s0 = inlined_call_operand.hbm [shape: f32[8,768], index: 0, kind: input, shape index: {}]   ;;  %s465_s1 = inlined_call_operand.hbm [shape: f32[1,768], index: 1, kind: input, shape index: {}]   ;;  %s466_s2 = inlined_call_operand.vmem [shape: f32[1,768], index: 2, kind: input, shape index: {}]   ;;  %s467_s3 = inlined_call_operand.hbm [shape: f32[8,768], index: 3, kind: output, shape index: {}]  }
   0x1   :  { %9 = vsyncpa [#allocation6], 0 }
   0x2   :  { %10 = vsyncpa [#allocation4], 0  ;;  %s372_s12 = smov [#allocation2]   ;;  %s373_s14 = smov [#allocation5]  }
   0x3   :  { %s17_s13 = sshll.u32 %s372_s12, 4  ;;  %s27_s15 = sshll.u32 %s373_s14, 4  ;;  %s18_s13 = int_to_ptr.vmem [resolvable:$true] %s17_s13  ;;  %s28_s15 = int_to_ptr.vmem [resolvable:$true] %s27_s15 }
   0x4   :  { %s300_s18 = scalar_lea.hbm %s464_s0, 768 }
   0x5   :  { %p301_p0 = scmp.ne.s32.totalorder %s464_s0, %s300_s18  ;;  %p304_p1 = scmp.lt.u32.totalorder %s300_s18, %s464_s0 }
   0x7   :  { %p306_p2 = pnand %p304_p1, %p301_p0 }
   0x9   :  { %309 = shalt.err (!%p306_p2)
}
   0xa   :  { %s310_s23 = scalar_lea.vmem %s18_s13, 768  ;;  %p315_p4 = scmp.lt.s32.totalorder %s18_s13, %s18_s13 }
   0xb   :  { %p311_p3 = scmp.ne.s32.totalorder %s18_s13, %s310_s23  ;;  %p316_p5 = scmp.lt.s32.totalorder %s310_s23, %s310_s23 }
   0xd   :  { %p317_p6 = por %p316_p5, %p315_p4 }
   0xf   :  { %p318_p7 = pnand %p317_p6, %p311_p3 }
  0x11   :  { %321 = shalt.err (!%p318_p7)
}
  0x12   :  { %20 = dma.hbm_to_vmem [thread:$0]  %s464_s0, 768, %s18_s13, [#allocation3]  }
  0x13   :  { %s322_s28 = scalar_lea.hbm %s465_s1, 96 }
  0x14   :  { %p323_p8 = scmp.ne.s32.totalorder %s465_s1, %s322_s28  ;;  %p326_p9 = scmp.lt.u32.totalorder %s322_s28, %s465_s1 }
  0x16   :  { %p328_p10 = pnand %p326_p9, %p323_p8 }
  0x18   :  { %331 = shalt.err (!%p328_p10)
}
  0x19   :  { %s332_s6 = scalar_lea.vmem %s28_s15, 96  ;;  %p337_p12 = scmp.lt.s32.totalorder %s28_s15, %s28_s15 }
  0x1a   :  { %p333_p11 = scmp.ne.s32.totalorder %s28_s15, %s332_s6  ;;  %p338_p13 = scmp.lt.s32.totalorder %s332_s6, %s332_s6 }
  0x1c   :  { %p339_p0 = por %p338_p13, %p337_p12 }
  0x1e   :  { %p340_p1 = pnand %p339_p0, %p333_p11 }
  0x20   :  { %343 = shalt.err (!%p340_p1)
}
  0x21   :  { %30 = dma.hbm_to_vmem [thread:$0]  %s465_s1, 96, %s28_s15, [#allocation6]  }
  0x22   :  { %366 = dma.done.wait [#allocation3], 768  }
  0x23   :  { %367 = vsyncadd [#allocation3], 4294966528 }
  0x24   :  { %368 = dma.done.wait [#allocation6], 96  }
  0x25   :  { %369 = vsyncadd [#allocation6], 4294967200  ;;  %v39_v0 = vld [vmem:[#allocation2] sm:$0xff]  ;;  %v40_v2 = vld [vmem:[#allocation2 + $0x8] sm:$0xff] }
  0x26   :  { %v45_v1 = vrot.slane %v39_v0, 4  ;;  %v41_v3 = vld [vmem:[#allocation2 + $0x10] sm:$0xff]  ;;  %v42_v4 = vld [vmem:[#allocation2 + $0x18] sm:$0xff]  ;;  %v51_v5 = vrot.slane %v40_v2, 4  ;;  %v43_v7 = vld [vmem:[#allocation2 + $0x20] sm:$0xff] }
  0x27   :  { %v57_v6 = vrot.slane %v41_v3, 4  ;;  %v63_v9 = vrot.slane %v42_v4, 4  ;;  %v44_v10 = vld [vmem:[#allocation2 + $0x28] sm:$0xff]  ;;  %v69_v13 = vrot.slane %v43_v7, 4 }
  0x28   :  { %v46_v8 = vadd.f32 %v45_v1, %v39_v0  ;;  %v52_v11 = vadd.f32 %v51_v5, %v40_v2  ;;  %v75_v19 = vrot.slane %v44_v10, 4 }
  0x29   :  { %v58_v12 = vadd.f32 %v57_v6, %v41_v3  ;;  %v64_v15 = vadd.f32 %v63_v9, %v42_v4  ;;  %v70_v18 = vadd.f32 %v69_v13, %v43_v7 }
  0x2a   :  { %v47_v14 = vrot.slane %v46_v8, 2  ;;  %v53_v16 = vrot.slane %v52_v11, 2  ;;  %v76_v25 = vadd.f32 %v75_v19, %v44_v10 }
  0x2b   :  { %v59_v17 = vrot.slane %v58_v12, 2  ;;  %v65_v21 = vrot.slane %v64_v15, 2  ;;  %v71_v24 = vrot.slane %v70_v18, 2 }
  0x2c   :  { %v48_v20 = vadd.f32 %v47_v14, %v46_v8  ;;  %v54_v22 = vadd.f32 %v53_v16, %v52_v11  ;;  %v77_v31 = vrot.slane %v76_v25, 2 }
  0x2d   :  { %v60_v23 = vadd.f32 %v59_v17, %v58_v12  ;;  %v66_v27 = vadd.f32 %v65_v21, %v64_v15  ;;  %v72_v30 = vadd.f32 %v71_v24, %v70_v18 }
  0x2e   :  { %v49_v26 = vrot.slane %v48_v20, 1  ;;  %v55_v28 = vrot.slane %v54_v22, 1  ;;  %v78_v37 = vadd.f32 %v77_v31, %v76_v25 }
  0x2f   :  { %v61_v29 = vrot.slane %v60_v23, 1  ;;  %v67_v33 = vrot.slane %v66_v27, 1  ;;  %v73_v36 = vrot.slane %v72_v30, 1 }
  0x30   :  { %v50_v32 = vadd.f32 %v49_v26, %v48_v20  ;;  %v56_v34 = vadd.f32 %v55_v28, %v54_v22  ;;  %v79_v43 = vrot.slane %v78_v37, 1 }
  0x31   :  { %v62_v35 = vadd.f32 %v61_v29, %v60_v23  ;;  %v68_v39 = vadd.f32 %v67_v33, %v66_v27  ;;  %v74_v42 = vadd.f32 %v73_v36, %v72_v30  ;;  %v160_v23 = vlaneseq }
  0x32   :  { %v82_v38 = vmul.f32 0.125, %v50_v32  ;;  %v83_v40 = vmul.f32 0.125, %v56_v34  ;;  %v80_v49 = vadd.f32 %v79_v43, %v78_v37 }
  0x33   :  { %v84_v41 = vmul.f32 0.125, %v62_v35  ;;  %v85_v45 = vmul.f32 0.125, %v68_v39  ;;  %v86_v48 = vmul.f32 0.125, %v74_v42  ;;  %v161_v36 = vshrl.u32 %v160_v23, 7 }
  0x34   :  { %v419_v44 = vsub.f32 %v39_v0, %v82_v38  ;;  %v421_v46 = vsub.f32 %v40_v2, %v83_v40  ;;  %v87_v55 = vmul.f32 0.125, %v80_v49 }
  0x35   :  { %v423_v47 = vsub.f32 %v41_v3, %v84_v41  ;;  %v427_v51 = vsub.f32 %v42_v4, %v85_v45  ;;  %v433_v54 = vsub.f32 %v43_v7, %v86_v48  ;;  %v162_v48 = vsub.s32 0, %v161_v36 }
  0x36   :  { %v94_v50 = vmul.f32 %v419_v44, %v419_v44  ;;  %v95_v52 = vmul.f32 %v421_v46, %v421_v46  ;;  %v439_v61 = vsub.f32 %v44_v10, %v87_v55  ;;  %v174_v55 = vsub.s32 3, %v161_v36 }
  0x37   :  { %v96_v53 = vmul.f32 %v423_v47, %v423_v47  ;;  %v97_v57 = vmul.f32 %v427_v51, %v427_v51  ;;  %v98_v60 = vmul.f32 %v433_v54, %v433_v54 }
  0x38   :  { %v100_v56 = vrot.slane %v94_v50, 4  ;;  %v106_v58 = vrot.slane %v95_v52, 4  ;;  %v99_v3 = vmul.f32 %v439_v61, %v439_v61 }
  0x39   :  { %v112_v59 = vrot.slane %v96_v53, 4  ;;  %v118_v63 = vrot.slane %v97_v57, 4  ;;  %v124_v2 = vrot.slane %v98_v60, 4 }
  0x3a   :  { %v101_v62 = vadd.f32 %v100_v56, %v94_v50  ;;  %v107_v0 = vadd.f32 %v106_v58, %v95_v52  ;;  %v130_v9 = vrot.slane %v99_v3, 4  ;;  %v144_v50 = vld [vmem:[#allocation5] sm:$0x3f]  ;;  %v166_v52 = vsub.s32 1, %v161_v36 }
  0x3b   :  { %v113_v1 = vadd.f32 %v112_v59, %v96_v53  ;;  %v119_v5 = vadd.f32 %v118_v63, %v97_v57  ;;  %v125_v8 = vadd.f32 %v124_v2, %v98_v60  ;;  %v170_v53 = vsub.s32 2, %v161_v36  ;;  %v146_v63 = vld [vmem:[%s466_s2] sm:$0x3f]  ;;  %s374_s2 = smov [#allocation7]  }
  0x3c   :  { %v102_v4 = vrot.slane %v101_v62, 2  ;;  %v108_v6 = vrot.slane %v107_v0, 2  ;;  %v131_v15 = vadd.f32 %v130_v9, %v99_v3  ;;  %v163_v56 = vrot.slane %v144_v50, %v162_v48  ;;  %s275_s9 = sshll.u32 %s374_s2, 4  ;;  %s276_s9 = int_to_ptr.vmem [resolvable:$true] %s275_s9 }
  0x3d   :  { %v114_v7 = vrot.slane %v113_v1, 2  ;;  %v120_v12 = vrot.slane %v119_v5, 2  ;;  %v126_v10 = vrot.slane %v125_v8, 2  ;;  %v178_v57 = vsub.s32 4, %v161_v36  ;;  %s344_s10 = scalar_lea.vmem %s276_s9, 768  ;;  %p349_p3 = scmp.lt.s32.totalorder %s276_s9, %s276_s9 }
  0x3e   :  { %v103_v11 = vadd.f32 %v102_v4, %v101_v62  ;;  %v109_v13 = vadd.f32 %v108_v6, %v107_v0  ;;  %v132_v21 = vrot.slane %v131_v15, 2  ;;  %v167_v58 = vrot.slane %v144_v50, %v166_v52  ;;  %p345_p2 = scmp.ne.s32.totalorder %s276_s9, %s344_s10  ;;  %p350_p4 = scmp.lt.s32.totalorder %s344_s10, %s344_s10 }
  0x3f   :  { %v115_v14 = vadd.f32 %v114_v7, %v113_v1  ;;  %v121_v17 = vadd.f32 %v120_v12, %v119_v5  ;;  %v127_v20 = vadd.f32 %v126_v10, %v125_v8  ;;  %v182_v59 = vsub.s32 5, %v161_v36 }
  0x40   :  { %v104_v16 = vrot.slane %v103_v11, 1  ;;  %v110_v18 = vrot.slane %v109_v13, 1  ;;  %v133_v28 = vadd.f32 %v132_v21, %v131_v15  ;;  %v171_v60 = vrot.slane %v144_v50, %v170_v53  ;;  %p351_p5 = por %p350_p4, %p349_p3 }
  0x41   :  { %v116_v19 = vrot.slane %v115_v14, 1  ;;  %v122_v24 = vrot.slane %v121_v17, 1  ;;  %v128_v27 = vrot.slane %v127_v20, 1  ;;  %v175_v0 = vrot.slane %v144_v50, %v174_v55 }
  0x42   :  { %v105_v22 = vadd.f32 %v104_v16, %v103_v11  ;;  %v111_v25 = vadd.f32 %v110_v18, %v109_v13  ;;  %v134_v34 = vrot.slane %v133_v28, 1  ;;  %v179_v3 = vrot.slane %v144_v50, %v178_v57  ;;  %p352_p6 = pnand %p351_p5, %p345_p2 }
  0x43   :  { %v117_v26 = vadd.f32 %v116_v19, %v115_v14  ;;  %v123_v30 = vadd.f32 %v122_v24, %v121_v17  ;;  %v129_v33 = vadd.f32 %v128_v27, %v127_v20  ;;  %v183_v6 = vrot.slane %v144_v50, %v182_v59 }
  0x44   :  { %v136_v29 = vmul.f32 0.125, %v105_v22  ;;  %v137_v31 = vmul.f32 0.125, %v111_v25  ;;  %v135_v41 = vadd.f32 %v134_v34, %v133_v28  ;;  %v230_v9 = vrot.slane %v146_v63, %v162_v48 }
  0x45   :  { %v138_v32 = vmul.f32 0.125, %v117_v26  ;;  %v139_v37 = vmul.f32 0.125, %v123_v30  ;;  %v140_v40 = vmul.f32 0.125, %v129_v33  ;;  %v234_v14 = vrot.slane %v146_v63, %v166_v52 }
  0x46   :  { %v147_v35 = vadd.f32 1e-05, %v136_v29  ;;  %v148_v38 = vadd.f32 1e-05, %v137_v31  ;;  %v141_v45 = vmul.f32 0.125, %v135_v41  ;;  %v238_v18 = vrot.slane %v146_v63, %v170_v53 }
  0x47   :  { %v149_v39 = vadd.f32 1e-05, %v138_v32  ;;  %v150_v42 = vadd.f32 1e-05, %v139_v37  ;;  %v151_v43 = vadd.f32 1e-05, %v140_v40  ;;  %v242_v22 = vrot.slane %v146_v63, %v174_v55 }
  0x48   :  { %288 = vrsqrt.f32 %v147_v35  ;;  %v152_v49 = vadd.f32 1e-05, %v141_v45  ;;  %v246_v27 = vrot.slane %v146_v63, %v178_v57  ;;  %v250_v31 = vrot.slane %v146_v63, %v182_v59 }
  0x49   :  { %290 = vrsqrt.f32 %v148_v38 }
  0x4a   :  { %292 = vrsqrt.f32 %v149_v39 }
  0x4b   :  { %294 = vrsqrt.f32 %v150_v42 }
  0x4c   :  { %296 = vrsqrt.f32 %v151_v43 }
  0x4d   :  { %298 = vrsqrt.f32 %v152_v49 }
  0x52   :  { %v289_v62 = vpop.eup %288 }
  0x53   :  { %v291_v1 = vpop.eup %290  ;;  %v190_v2 = vmul.f32 %v289_v62, %v163_v56 }
  0x54   :  { %v293_v4 = vpop.eup %292  ;;  %v191_v5 = vmul.f32 %v291_v1, %v167_v58 }
  0x55   :  { %v295_v7 = vpop.eup %294  ;;  %v199_v8 = vrot.slane %v190_v2, %v162_v48  ;;  %v192_v11 = vmul.f32 %v293_v4, %v171_v60 }
  0x56   :  { %v297_v12 = vpop.eup %296  ;;  %v203_v13 = vrot.slane %v191_v5, %v162_v48  ;;  %v193_v10 = vmul.f32 %v295_v7, %v175_v0 }
  0x57   :  { %v299_v15 = vpop.eup %298  ;;  %v220_v16 = vmul.f32 %v199_v8, %v419_v44  ;;  %v207_v17 = vrot.slane %v192_v11, %v162_v48  ;;  %v194_v19 = vmul.f32 %v297_v12, %v179_v3 }
  0x58   :  { %v221_v20 = vmul.f32 %v203_v13, %v421_v46  ;;  %v211_v21 = vrot.slane %v193_v10, %v162_v48  ;;  %v195_v23 = vmul.f32 %v299_v15, %v183_v6 }
  0x59   :  { %v257_v24 = vadd.f32 %v230_v9, %v220_v16  ;;  %v222_v25 = vmul.f32 %v207_v17, %v423_v47  ;;  %v215_v26 = vrot.slane %v194_v19, %v162_v48 }
  0x5a   :  { %v258_v28 = vadd.f32 %v234_v14, %v221_v20  ;;  %v223_v29 = vmul.f32 %v211_v21, %v427_v51  ;;  %v219_v30 = vrot.slane %v195_v23, %v162_v48 }
  0x5b   :  { %263 = vst [vmem:[#allocation7] sm:$0xff] %v257_v24  ;;  %v259_v44 = vadd.f32 %v238_v18, %v222_v25  ;;  %v224_v32 = vmul.f32 %v215_v26, %v433_v54 }
  0x5c   :  { %264 = vst [vmem:[#allocation7 + $0x8] sm:$0xff] %v258_v28  ;;  %v260_v46 = vadd.f32 %v242_v22, %v223_v29  ;;  %v225_v33 = vmul.f32 %v219_v30, %v439_v61 }
  0x5d   :  { %265 = vst [vmem:[#allocation7 + $0x10] sm:$0xff] %v259_v44  ;;  %v261_v34 = vadd.f32 %v246_v27, %v224_v32 }
  0x5e   :  { %266 = vst [vmem:[#allocation7 + $0x18] sm:$0xff] %v260_v46  ;;  %v262_v47 = vadd.f32 %v250_v31, %v225_v33 }
  0x5f   :  { %267 = vst [vmem:[#allocation7 + $0x20] sm:$0xff] %v261_v34 }
  0x60   :  { %268 = vst [vmem:[#allocation7 + $0x28] sm:$0xff] %v262_v47 }
  0x61   :  { %355 = shalt.err (!%p352_p6)
}
  0x62   :  { %s356_s13 = scalar_lea.hbm %s467_s3, 768 }
  0x63   :  { %p357_p7 = scmp.ne.s32.totalorder %s467_s3, %s356_s13  ;;  %p360_p8 = scmp.lt.u32.totalorder %s356_s13, %s467_s3 }
  0x65   :  { %p362_p9 = pnand %p360_p8, %p357_p7 }
  0x67   :  { %365 = shalt.err (!%p362_p9)
}
  0x68   :  { %278 = dma.vmem_to_hbm [thread:$0]  %s276_s9, 768, %s467_s3, [#allocation4]  }
  0x69   :  { %370 = dma.done.wait [#allocation4], 768  }
  0x6a   :  { %371 = vsyncadd [#allocation4], 4294966528 }
  0x6b   :  { %282 = vsyncpa [#allocation3], 1 }
  0x6c   :  { %283 = vsyncpa [#allocation6], 1 }
  0x6d   :  { %284 = vsyncpa [#allocation4], 1 }

</bundles_post_ra>
